<compile_context>
chip_gen: v7x
topology: tpu7x:2x2x1
jax: 0.10.0
libtpu: 0.0.40
codegen_flags: <defaults>
</compile_context>

<pallas_src>
import functools

import jax
import jax.numpy as jnp
from jax.experimental import pallas as pl
from jax.experimental.pallas import tpu as pltpu


def _dice_kernel(x_ref, t_ref, inter_ref, card_ref, *, C, tile, hw):
    i = pl.program_id(1)  # pixel-tile index (reduction axis)

    @pl.when(i == 0)
    def _():
        inter_ref[...] = jnp.zeros_like(inter_ref)
        card_ref[...] = jnp.zeros_like(card_ref)

    x = x_ref[...].astype(jnp.float32)                    # (C, tile) logits
    # softmax over the class (sublane) axis
    m = jnp.max(x, axis=0, keepdims=True)                 # (1, tile)
    e = jnp.exp(x - m)                                    # (C, tile)
    denom = jnp.sum(e, axis=0, keepdims=True)             # (1, tile)
    p = e * pl.reciprocal(denom, approx=False)            # (C, tile) probs

    # one-hot encode targets: compare class iota against target labels
    t = t_ref[...]                                        # (1, tile) int32
    cls = jax.lax.broadcasted_iota(jnp.int32, (C, tile), 0)
    one_hot = (cls == t).astype(jnp.float32)              # (C, tile)

    # mask padded pixels only when the last tile is ragged (static condition)
    if hw % tile != 0:
        pix = i * tile + jax.lax.broadcasted_iota(jnp.int32, (1, tile), 1)
        valid = (pix < hw).astype(jnp.float32)            # (1, tile)
        p = p * valid
        one_hot = one_hot * valid

    # Lane-dense partial sums: fold the tile into 128-lane columns with pure
    # VPU adds (128-aligned lane slices are vreg-column selects, no XLU).
    # The cross-lane reduction is deferred to JAX after the kernel.
    inter_p = jnp.zeros((C, 128), jnp.float32)
    sum_p = jnp.zeros((C, 128), jnp.float32)
    sum_o = jnp.zeros((C, 128), jnp.float32)
    for k in range(tile // 128):
        pk = p[:, k * 128:(k + 1) * 128]
        ok = one_hot[:, k * 128:(k + 1) * 128]
        inter_p = inter_p + pk * ok
        sum_p = sum_p + pk
        sum_o = sum_o + ok

    inter_ref[...] += inter_p
    card_ref[...] += sum_p + sum_o


def dice_loss(logits, targets, smooth=1.0, max_tile=8192):
    """logits: (N, C, H, W) float; targets: (N, H, W) int in [0, C-1]."""
    N, C, H, W = logits.shape
    HW = H * W

    # Free, contiguous reshapes (no transpose, no dtype cast in HBM).
    x = logits.reshape(N, C, HW)
    t = targets.reshape(N, 1, HW).astype(jnp.int32)

    # Pick a lane tile: multiple of 128, as large as the per-input VMEM budget
    # allows (2 pipeline buffers x C x tile x itemsize <= ~8 MiB), capped at
    # max_tile, and chosen so the padded pixel extent is an exact multiple.
    itemsize = jnp.dtype(logits.dtype).itemsize
    budget = 8 * 1024 * 1024
    tile_cap = max(128, (budget // (2 * C * itemsize)) // 128 * 128)
    tile_max = min(max_tile, tile_cap)

    hw128 = pl.cdiv(HW, 128) * 128
    n_tiles = pl.cdiv(hw128, tile_max)
    tile = pl.cdiv(pl.cdiv(hw128, n_tiles), 128) * 128
    hw_pad = n_tiles * tile
    if hw_pad != HW:
        x = jnp.pad(x, ((0, 0), (0, 0), (0, hw_pad - HW)))
        t = jnp.pad(t, ((0, 0), (0, 0), (0, hw_pad - HW)))

    kernel = functools.partial(_dice_kernel, C=C, tile=tile, hw=HW)

    inter, card = pl.pallas_call(
        kernel,
        out_shape=(
            jax.ShapeDtypeStruct((N, C, 128), jnp.float32),   # per-batch inter
            jax.ShapeDtypeStruct((N, C, 128), jnp.float32),   # per-batch card
        ),
        grid_spec=pltpu.PrefetchScalarGridSpec(
            num_scalar_prefetch=0,
            grid=(N, n_tiles),
            in_specs=[
                pl.BlockSpec((pl.Squeezed(), C, tile), lambda n, i: (n, 0, i)),
                pl.BlockSpec((pl.Squeezed(), 1, tile), lambda n, i: (n, 0, i)),
            ],
            out_specs=[
                pl.BlockSpec((pl.Squeezed(), C, 128), lambda n, i: (n, 0, 0)),
                pl.BlockSpec((pl.Squeezed(), C, 128), lambda n, i: (n, 0, 0)),
            ],
        ),
        compiler_params=pltpu.CompilerParams(
            dimension_semantics=("parallel", "arbitrary")),
    )(x, t)

    # Tiny final combine in plain JAX: cross-lane + cross-batch reductions,
    # then the per-class dice and mean.
    inter_c = jnp.sum(inter, axis=(0, 2))                 # (C,)
    card_c = jnp.sum(card, axis=(0, 2))                   # (C,)
    dice = (2.0 * inter_c + smooth) / (card_c + smooth)
    return 1.0 - jnp.mean(dice)


def _dice_loss_ref(logits, targets, smooth=1.0):
    """Pure-JAX reference mirroring the PyTorch module."""
    probs = jax.nn.softmax(logits.astype(jnp.float32), axis=1)
    C = logits.shape[1]
    one_hot = jax.nn.one_hot(targets, C, dtype=jnp.float32)       # (N,H,W,C)
    one_hot = jnp.transpose(one_hot, (0, 3, 1, 2))                # (N,C,H,W)
    dims = (0, 2, 3)
    inter = jnp.sum(probs * one_hot, axis=dims)
    card = jnp.sum(probs + one_hot, axis=dims)
    dice = (2.0 * inter + smooth) / (card + smooth)
    return 1.0 - jnp.mean(dice)


if __name__ == "__main__":
    key = jax.random.PRNGKey(0)
    k1, k2 = jax.random.split(key)

    N, C, H, W = 2, 4, 16, 16
    logits = jax.random.normal(k1, (N, C, H, W), dtype=jnp.float32)
    targets = jax.random.randint(k2, (N, H, W), 0, C, dtype=jnp.int32)

    loss = dice_loss(logits, targets, smooth=1.0)
    loss = jax.block_until_ready(loss)

    ref = jax.block_until_ready(_dice_loss_ref(logits, targets, smooth=1.0))
    assert jnp.allclose(loss, ref, atol=1e-5, rtol=1e-5), (loss, ref)

    print("KERNEL_OK")
</pallas_src>

<mosaic_0001>
module attributes {stable_mosaic.version = 11 : i64} {
  func.func @_dice_kernel(%arg0: i32, %arg1: i32, %arg2: memref<1x4x256xf32, #tpu.memory_space<vmem>>, %arg3: memref<1x1x256xi32, #tpu.memory_space<vmem>>, %arg4: memref<1x4x128xf32, #tpu.memory_space<vmem>>, %arg5: memref<1x4x128xf32, #tpu.memory_space<vmem>>) attributes {dimension_semantics = [#tpu.dimension_semantics<parallel>, #tpu.dimension_semantics<arbitrary>], iteration_bounds = array<i64: 2, 1>, scalar_prefetch = 0 : i64, scratch_operands = 0 : i64, tpu.core_type = #tpu.core_type<tc>, window_params = [{transform_indices = @transform_0, window_bounds = array<i64: 1, 4, 256>}, {transform_indices = @transform_1, window_bounds = array<i64: 1, 1, 256>}, {transform_indices = @transform_2, window_bounds = array<i64: 1, 4, 128>}, {transform_indices = @transform_3, window_bounds = array<i64: 1, 4, 128>}]} {
    %c0_i32 = arith.constant 0 : i32
    %0 = arith.cmpi eq, %arg1, %c0_i32 : i32
    %1 = arith.extui %0 : i1 to i32
    %c0_i32_0 = arith.constant 0 : i32
    %2 = arith.cmpi ne, %1, %c0_i32_0 : i32
    scf.if %2 {
      %cst_22 = arith.constant 0.000000e+00 : f32
      %50 = vector.broadcast %cst_22 : f32 to vector<4x128xf32>
      %c0_23 = arith.constant 0 : index
      %c0_24 = arith.constant 0 : index
      %c0_25 = arith.constant 0 : index
      %51 = vector.load %arg4[%c0_23, %c0_24, %c0_25] : memref<1x4x128xf32, #tpu.memory_space<vmem>>, vector<1x4x128xf32>
      %52 = vector.shape_cast %51 : vector<1x4x128xf32> to vector<4x128xf32>
      %53 = vector.shape_cast %50 : vector<4x128xf32> to vector<1x4x128xf32>
      tpu.vector_store %arg4[%c0_23, %c0_24, %c0_25], %53 {strides = array<i32>} : memref<1x4x128xf32, #tpu.memory_space<vmem>>, vector<1x4x128xf32>,
      %cst_26 = arith.constant 0.000000e+00 : f32
      %54 = vector.broadcast %cst_26 : f32 to vector<4x128xf32>
      %c0_27 = arith.constant 0 : index
      %c0_28 = arith.constant 0 : index
      %c0_29 = arith.constant 0 : index
      %55 = vector.load %arg5[%c0_27, %c0_28, %c0_29] : memref<1x4x128xf32, #tpu.memory_space<vmem>>, vector<1x4x128xf32>
      %56 = vector.shape_cast %55 : vector<1x4x128xf32> to vector<4x128xf32>
      %57 = vector.shape_cast %54 : vector<4x128xf32> to vector<1x4x128xf32>
      tpu.vector_store %arg5[%c0_27, %c0_28, %c0_29], %57 {strides = array<i32>} : memref<1x4x128xf32, #tpu.memory_space<vmem>>, vector<1x4x128xf32>,
    } else {
    }
    %c0 = arith.constant 0 : index
    %c0_1 = arith.constant 0 : index
    %c0_2 = arith.constant 0 : index
    %3 = vector.load %arg2[%c0, %c0_1, %c0_2] : memref<1x4x256xf32, #tpu.memory_space<vmem>>, vector<1x4x256xf32>
    %4 = vector.shape_cast %3 : vector<1x4x256xf32> to vector<4x256xf32>
    %cst = arith.constant dense<0xFF800000> : vector<256xf32>
    %5 = vector.multi_reduction <maximumf>, %4, %cst [0] : vector<4x256xf32> to vector<256xf32>
    %6 = vector.shape_cast %5 : vector<256xf32> to vector<1x256xf32>
    %7 = vector.broadcast %6 : vector<1x256xf32> to vector<4x256xf32>
    %8 = arith.subf %4, %7 : vector<4x256xf32>
    %9 = math.exp %8 : vector<4x256xf32>
    %cst_3 = arith.constant dense<0.000000e+00> : vector<256xf32>
    %10 = vector.multi_reduction <add>, %9, %cst_3 [0] : vector<4x256xf32> to vector<256xf32>
    %11 = vector.shape_cast %10 : vector<256xf32> to vector<1x256xf32>
    %12 = tpu.reciprocal %11 : vector<1x256xf32> -> vector<1x256xf32>
    %13 = vector.broadcast %12 : vector<1x256xf32> to vector<4x256xf32>
    %14 = arith.mulf %9, %13 : vector<4x256xf32>
    %c0_4 = arith.constant 0 : index
    %c0_5 = arith.constant 0 : index
    %c0_6 = arith.constant 0 : index
    %15 = vector.load %arg3[%c0_4, %c0_5, %c0_6] : memref<1x1x256xi32, #tpu.memory_space<vmem>>, vector<1x1x256xi32>
    %16 = vector.shape_cast %15 : vector<1x1x256xi32> to vector<1x256xi32>
    %17 = tpu.iota {dimensions = array<i32: 0>} : vector<4x256xi32>
    %18 = vector.broadcast %16 : vector<1x256xi32> to vector<4x256xi32>
    %19 = arith.cmpi eq, %17, %18 : vector<4x256xi32>
    %20 = arith.extui %19 : vector<4x256xi1> to vector<4x256xi32>
    %21 = arith.sitofp %20 : vector<4x256xi32> to vector<4x256xf32>
    %cst_7 = arith.constant 0.000000e+00 : f32
    %22 = vector.broadcast %cst_7 : f32 to vector<4x128xf32>
    %cst_8 = arith.constant 0.000000e+00 : f32
    %23 = vector.broadcast %cst_8 : f32 to vector<4x128xf32>
    %cst_9 = arith.constant 0.000000e+00 : f32
    %24 = vector.broadcast %cst_9 : f32 to vector<4x128xf32>
    %25 = vector.extract_strided_slice %14 {offsets = [0, 0], sizes = [4, 128], strides = [1, 1]} : vector<4x256xf32> to vector<4x128xf32>
    %26 = vector.extract_strided_slice %21 {offsets = [0, 0], sizes = [4, 128], strides = [1, 1]} : vector<4x256xf32> to vector<4x128xf32>
    %27 = arith.mulf %25, %26 : vector<4x128xf32>
    %28 = arith.addf %22, %27 : vector<4x128xf32>
    %29 = arith.addf %23, %25 : vector<4x128xf32>
    %30 = arith.addf %24, %26 : vector<4x128xf32>
    %31 = vector.extract_strided_slice %14 {offsets = [0, 128], sizes = [4, 128], strides = [1, 1]} : vector<4x256xf32> to vector<4x128xf32>
    %32 = vector.extract_strided_slice %21 {offsets = [0, 128], sizes = [4, 128], strides = [1, 1]} : vector<4x256xf32> to vector<4x128xf32>
    %33 = arith.mulf %31, %32 : vector<4x128xf32>
    %34 = arith.addf %28, %33 : vector<4x128xf32>
    %35 = arith.addf %29, %31 : vector<4x128xf32>
    %36 = arith.addf %30, %32 : vector<4x128xf32>
    %c0_10 = arith.constant 0 : index
    %c0_11 = arith.constant 0 : index
    %c0_12 = arith.constant 0 : index
    %37 = vector.load %arg4[%c0_10, %c0_11, %c0_12] : memref<1x4x128xf32, #tpu.memory_space<vmem>>, vector<1x4x128xf32>
    %38 = vector.shape_cast %37 : vector<1x4x128xf32> to vector<4x128xf32>
    %39 = arith.addf %38, %34 : vector<4x128xf32>
    %c0_13 = arith.constant 0 : index
    %c0_14 = arith.constant 0 : index
    %c0_15 = arith.constant 0 : index
    %40 = vector.load %arg4[%c0_13, %c0_14, %c0_15] : memref<1x4x128xf32, #tpu.memory_space<vmem>>, vector<1x4x128xf32>
    %41 = vector.shape_cast %40 : vector<1x4x128xf32> to vector<4x128xf32>
    %42 = vector.shape_cast %39 : vector<4x128xf32> to vector<1x4x128xf32>
    tpu.vector_store %arg4[%c0_13, %c0_14, %c0_15], %42 {strides = array<i32>} : memref<1x4x128xf32, #tpu.memory_space<vmem>>, vector<1x4x128xf32>,
    %c0_16 = arith.constant 0 : index
    %c0_17 = arith.constant 0 : index
    %c0_18 = arith.constant 0 : index
    %43 = vector.load %arg5[%c0_16, %c0_17, %c0_18] : memref<1x4x128xf32, #tpu.memory_space<vmem>>, vector<1x4x128xf32>
    %44 = vector.shape_cast %43 : vector<1x4x128xf32> to vector<4x128xf32>
    %45 = arith.addf %35, %36 : vector<4x128xf32>
    %46 = arith.addf %44, %45 : vector<4x128xf32>
    %c0_19 = arith.constant 0 : index
    %c0_20 = arith.constant 0 : index
    %c0_21 = arith.constant 0 : index
    %47 = vector.load %arg5[%c0_19, %c0_20, %c0_21] : memref<1x4x128xf32, #tpu.memory_space<vmem>>, vector<1x4x128xf32>
    %48 = vector.shape_cast %47 : vector<1x4x128xf32> to vector<4x128xf32>
    %49 = vector.shape_cast %46 : vector<4x128xf32> to vector<1x4x128xf32>
    tpu.vector_store %arg5[%c0_19, %c0_20, %c0_21], %49 {strides = array<i32>} : memref<1x4x128xf32, #tpu.memory_space<vmem>>, vector<1x4x128xf32>,
    return
  }
  func.func @transform_0(%arg0: i32, %arg1: i32) -> (i32, i32, i32) {
    %c0_i32 = arith.constant 0 : i32
    %c0_i32_0 = arith.constant 0 : i32
    return %arg0, %c0_i32, %arg1 : i32, i32, i32
  }
  func.func @transform_1(%arg0: i32, %arg1: i32) -> (i32, i32, i32) {
    %c0_i32 = arith.constant 0 : i32
    %c0_i32_0 = arith.constant 0 : i32
    return %arg0, %c0_i32, %arg1 : i32, i32, i32
  }
  func.func @transform_2(%arg0: i32, %arg1: i32) -> (i32, i32, i32) {
    %c0_i32 = arith.constant 0 : i32
    %c0_i32_0 = arith.constant 0 : i32
    %c0_i32_1 = arith.constant 0 : i32
    return %arg0, %c0_i32, %c0_i32_0 : i32, i32, i32
  }
  func.func @transform_3(%arg0: i32, %arg1: i32) -> (i32, i32, i32) {
    %c0_i32 = arith.constant 0 : i32
    %c0_i32_0 = arith.constant 0 : i32
    %c0_i32_1 = arith.constant 0 : i32
    return %arg0, %c0_i32, %c0_i32_0 : i32, i32, i32
  }
}

</mosaic_0001>

<bundles_post_ra>
// kernel: tpu_custom_call.1
= control target key start
LH: loop header
LB: loop body
LE: loop exit
PB: predicated region body
PF: predicated region fallthrough
CT: control target
= control target key end

     0   :  { %9 = vsyncpa [#allocation3], 0  ;;  %s1094_s0 = inlined_call_operand.hbm [shape: f32[2,4,256], index: 0, kind: input, shape index: {}]   ;;  %s1095_s1 = inlined_call_operand.hbm [shape: s32[2,1,256], index: 1, kind: input, shape index: {}]   ;;  %s1096_s2 = inlined_call_operand.hbm [shape: f32[2,4,128], index: 2, kind: output, shape index: {0}]   ;;  %s1097_s3 = inlined_call_operand.hbm [shape: f32[2,4,128], index: 3, kind: output, shape index: {1}]  }
   0x1   :  { %11 = vsyncpa [#allocation3 + $0x1], 0 }
   0x2   :  { %12 = vsyncpa [#allocation6], 0 }
   0x3   :  { %14 = vsyncpa [#allocation6 + $0x1], 0 }
   0x4   :  { %15 = vsyncpa [#allocation4], 0 }
   0x5   :  { %17 = vsyncpa [#allocation4 + $0x1], 0 }
   0x6   :  { %18 = vsyncpa [#allocation9], 0 }
   0x7   :  { %20 = vsyncpa [#allocation9 + $0x1], 0  ;;  %s830_s12 = smov 0   ;;  %s832_s13 = smov 0  }
   0x8   :  { %s834_s14 = smov 0   ;;  %s836_s15 = smov 0  }
   0x9   :  { %s838_s16 = smov 0   ;;  %s840_s17 = smov 0  }
   0xa LB: > { %s520_s18 = sadd.s32 4294967295, %s803_s17   ;;  %s521_s19 = sadd.s32 4294967294, %s803_s17   ;;  %s803_s17 = sphi %s840_s17, %s26_s17   ;;  %s799_s16 = sphi %s838_s16, %s1117_s16   ;;  %s795_s15 = sphi %s836_s15, %s1116_s15   ;;  %s791_s14 = sphi %s834_s14, %s1115_s14   ;;  %s787_s13 = sphi %s832_s13, %s1114_s13   ;;  %s783_s12 = sphi %s830_s12, %s1113_s12  }
   0xb   : > { %s38_s20 = sadd.s32 1, %s799_s16  ;;  %s47_s21 = sadd.s32 1, %s791_s14 }
   0xc   : > { %p40_p0 = scmp.ge.s32.totalorder %s38_s20, 2  ;;  %p54_p1 = scmp.ne.s32.totalorder %s791_s14, %s787_s13 }
   0xd   : > { %p55_p2 = scmp.eq.s32.totalorder %s803_s17, 0  ;;  %p60_p3 = scmp.ne.s32.totalorder %s787_s13, %s783_s12 }
   0xe   : > { %s1119_s20 = smov (%p40_p0, %s38_s20), 0  ;;  %p61_p5 = scmp.eq.s32.totalorder %s520_s18, 0 }
   0xf   : > { %p871_p4 = por %p55_p2, %p54_p1  ;;  %s42_s23 = ssub.s32 %s799_s16, %s1119_s20 }
  0x10   : > { %p112_p6 = scmp.eq.s32.totalorder %s520_s18, 1  ;;  %p45_p7 = scmp.eq.s32.totalorder %s42_s23, 0 }
  0x11   : > { %p877_p8 = por %p61_p5, %p60_p3  ;;  %p118_p10 = scmp.eq.s32.totalorder %s521_s19, 1 }
  0x12   : > { %p881_p9 = por %p112_p6, %p54_p1  ;;  %p567_p13 = scmp.lt.s32.totalorder %s803_s17, 2 }
  0x13   : > { %s1101_s24 = scalar_select %p877_p8, 1, 0 }
  0x14   : > { %s1102_s25 = scalar_select %p881_p9, 1, 0 }
  0x15   : > { %s886_s26 = scalar_select %p45_p7, %s791_s14, %s47_s21  }
  0x16   : > { %p888_p11 = por %p118_p10, %p60_p3  ;;  %s895_s28 = sand.u32 1, %s791_s14  }
  0x17   : > { %s524_s29 = sshll.u32 %s895_s28, 3  ;;  %s543_s30 = sshll.u32 %s799_s16, 7 }
  0x18   : > { %s1103_s27 = scalar_select %p888_p11, 1, 0 }
  0x19   : > { %s902_s6 = scalar_lea.hbm %s1094_s0, %s543_s30  ;;  %s168_s7 = scalar_lea.vmem [#allocation2], %s524_s29 }
  0x1a   : > { %s178_s8 = sshll.u32 %s168_s7, 4  ;;  %p908_p0 = pnand %p567_p13, %p871_p4  ;;  %s904_s8 = int_to_ptr.vmem [resolvable:$true] %s178_s8 }
  0x1b   : > { %s165_s10 = scalar_lea.sflag [#allocation3], %s895_s28  ;;  %s625_s11 = scalar_lea.hbm %s902_s6, 128 }
  0x1c   : > { %p626_p3 = scmp.ne.s32.totalorder %s902_s6, %s625_s11  ;;  %p627_p5 = pneg %p908_p0 }
  0x1d   : > { %s630_s21 = scalar_lea.hbm %s1094_s0, 256  ;;  %p631_p4 = scmp.lt.u32.totalorder %s902_s6, %s1094_s0 }
  0x1e   : > { %p628_p6 = pnand %p627_p5, %p626_p3  ;;  %p632_p10 = scmp.lt.u32.totalorder %s630_s21, %s625_s11 }
  0x1f   : > { %p634_p12 = scmp.lt.u32.totalorder %s625_s11, %s902_s6 }
  0x20   : > { %p629_p7 = pneg %p628_p6  ;;  %p633_p13 = por %p632_p10, %p631_p4 }
  0x22   : > { %p635_p1 = por %p634_p12, %p633_p13 }
  0x24   : > { %p636_p2 = pnand %p635_p1, %p629_p7 }
  0x26   : > { %639 = shalt.err (!%p636_p2)
}
  0x27   : > { %s640_s29 = scalar_lea.vmem %s904_s8, 128  ;;  %s805_s30 = smov [#allocation2]  }
  0x28   : > { %p641_p3 = scmp.ne.s32.totalorder %s904_s8, %s640_s29  ;;  %s645_s4 = sshll.u32 %s805_s30, 4  ;;  %s646_s4 = int_to_ptr.vmem [resolvable:$false] %s645_s4 }
  0x29   : > { %s647_s5 = scalar_lea.vmem %s646_s4, 256  ;;  %p648_p9 = scmp.lt.s32.totalorder %s904_s8, %s646_s4 }
  0x2a   : > { %p643_p6 = pnand %p641_p3, %p627_p5  ;;  %p649_p4 = scmp.lt.s32.totalorder %s647_s5, %s640_s29 }
  0x2c   : > { %p644_p11 = pneg %p643_p6  ;;  %p650_p10 = por %p649_p4, %p648_p9 }
  0x2e   : > { %p651_p12 = pnand %p650_p10, %p644_p11 }
  0x30   : > { %654 = shalt.err (!%p651_p12)
}
  0x31   : > { %556 = dma.hbm_to_vmem [thread:$0]  (!%p908_p0), %s902_s6, 128, %s904_s8, %s165_s10  }
  0x32   : > { %p1105_p1 = scmp.lt.s32.totalorder %s803_s17, 3  ;;  %p1106_p2 = scmp.ge.s32.totalorder %s803_s17, 1 }
  0x33   : > { %s527_s11 = sshll.u32 %s895_s28, 1  ;;  %s544_s18 = sshll.u32 %s799_s16, 5 }
  0x34   : > { %p944_p7 = pnand %p1106_p2, %p1105_p1  ;;  %s953_s22 = scalar_lea.hbm %s1095_s1, %s544_s18 }
  0x35   : > { %s189_s23 = scalar_lea.vmem [#allocation5], %s527_s11  ;;  %s186_s6 = scalar_lea.sflag [#allocation6], %s895_s28 }
  0x36   : > { %s1107_s7 = scalar_select %p944_p7, 1, 0 }
  0x37   : > { %s199_s29 = sshll.u32 %s189_s23, 4  ;;  %s655_s8 = scalar_lea.hbm %s953_s22, 32  ;;  %s200_s29 = int_to_ptr.vmem [resolvable:$true] %s199_s29 }
  0x38   : > { %p656_p9 = scmp.ne.s32.totalorder %s953_s22, %s655_s8  ;;  %s660_s4 = scalar_lea.hbm %s1095_s1, 64 }
  0x39   : > { %p661_p3 = scmp.lt.u32.totalorder %s953_s22, %s1095_s1  ;;  %p662_p6 = scmp.lt.u32.totalorder %s660_s4, %s655_s8 }
  0x3a   : > { %p658_p11 = pnand %p656_p9, %p627_p5  ;;  %p664_p10 = scmp.lt.u32.totalorder %s655_s8, %s953_s22 }
  0x3b   : > { %p663_p4 = por %p662_p6, %p661_p3 }
  0x3c   : > { %p659_p13 = pneg %p658_p11 }
  0x3d   : > { %p665_p12 = por %p664_p10, %p663_p4 }
  0x3f   : > { %p666_p1 = pnand %p665_p12, %p659_p13 }
  0x41   : > { %669 = shalt.err (!%p666_p1)
}
  0x42   : > { %s670_s28 = scalar_lea.vmem %s200_s29, 32  ;;  %s806_s11 = smov [#allocation5]  }
  0x43   : > { %p671_p2 = scmp.ne.s32.totalorder %s200_s29, %s670_s28  ;;  %s675_s19 = sshll.u32 %s806_s11, 4  ;;  %s676_s19 = int_to_ptr.vmem [resolvable:$false] %s675_s19 }
  0x44   : > { %s677_s21 = scalar_lea.vmem %s676_s19, 64  ;;  %p678_p8 = scmp.lt.s32.totalorder %s200_s29, %s676_s19 }
  0x45   : > { %p673_p9 = pnand %p671_p2, %p627_p5  ;;  %p679_p7 = scmp.lt.s32.totalorder %s677_s21, %s670_s28 }
  0x47   : > { %p674_p11 = pneg %p673_p9  ;;  %p680_p3 = por %p679_p7, %p678_p8 }
  0x49   : > { %p681_p6 = pnand %p680_p3, %p674_p11 }
  0x4b   : > { %684 = shalt.err (!%p681_p6)
}
  0x4c   : > { %559 = dma.hbm_to_vmem [thread:$0]  (!%p908_p0), %s953_s22, 32, %s200_s29, %s186_s6  }
  0x4d   : > { %p1108_p13 = scmp.ne.s32.totalorder %s1107_s7, 0 }
  0x4e   : > { %s978_s23 = sand.u32 (!%p1108_p13), 1, %s787_s13   ;;  %p1109_p5 = scmp.ne.s32.totalorder (!%p1108_p13), %s1101_s24, 0 }
  0x4f   : > { %208 = sbr.rel (%p1108_p13) target bundleno = 198 (0xc6), region = 28  ;;  %s531_s8 = sshll.u32 (!%p1108_p13), %s978_s23, 3 }
  0x50   : > { %s211_s10 = scalar_lea.sflag (!%p1108_p13), [#allocation3], %s978_s23  ;;  %s214_s30 = scalar_lea.vmem (!%p1108_p13), [#allocation2], %s531_s8 }
  0x56   : > { %766 = dma.done.wait (%p1109_p5), %s211_s10, 128  }
  0x57   : > { %768 = vsyncadd (%p1109_p5), %s211_s10, 4294967168  ;;  %s532_s9 = sshll.u32 %s978_s23, 1  ;;  %s220_s7 = scalar_lea.sflag [#allocation6], %s978_s23 }
  0x58   : > { %s988_s22 = scalar_lea.vmem [#allocation5], %s532_s9 }
  0x59   : > { %770 = dma.done.wait (%p1109_p5), %s220_s7, 32  }
  0x5a   : > { %772 = vsyncadd (%p1109_p5), %s220_s7, 4294967264  ;;  %s533_s29 = sshll.u32 %s978_s23, 2  ;;  %v807_v0 = vmov 0.0   ;;  %vm268_vm0 = vcmask 1043456   ;;  %v264_v1 = vld [vmem:[%s214_s30] sm:$0xff]  ;;  %v315_v31 = vlaneseq  ;;  %s539_s24 = sshll.u32 %s795_s15, 6 }
  0x5b   : > { %s995_s6 = scalar_lea.vmem [#allocation7], %s533_s29  ;;  %s998_s4 = scalar_lea.vmem [#allocation8], %s533_s29  ;;  %v266_v2 = vcombine.high %v264_v1, %v264_v1  ;;  %v269_v3 = vsel %vm268_vm0, %v264_v1, -inf  ;;  %v314_v40 = vld [vmem:[%s988_s22] sm:$0x3] }
  0x5c   : > { %262 = vst [vmem:[%s995_s6] sm:$0xf] %v807_v0  ;;  %263 = vst [vmem:[%s998_s4] sm:$0xf] %v807_v0  ;;  %v270_v4 = vrot.slane %v269_v3, 4  ;;  %v316_v36 = vshrl.u32 %v315_v31, 7  ;;  %s368_s5 = sshll.u32 %s995_s6, 4  ;;  %s381_s18 = sshll.u32 %s998_s4, 4  ;;  %s1016_s5 = int_to_ptr.vmem [resolvable:$true] %s368_s5  ;;  %s1023_s18 = int_to_ptr.vmem [resolvable:$true] %s381_s18 }
  0x5d   : > { %v276_v5 = vsel %vm268_vm0, %v266_v2, -inf  ;;  %s1014_s19 = scalar_lea.hbm %s1096_s2, %s539_s24  ;;  %s1021_s15 = scalar_lea.hbm %s1097_s3, %s539_s24 }
  0x5e   : > { %v271_v6 = vmax.f32 %v269_v3, %v270_v4  ;;  %v277_v7 = vrot.slane %v276_v5, 4  ;;  %v319_v38 = vsub.s32 0, %v316_v36  ;;  %v323_v39 = vsub.s32 1, %v316_v36  ;;  %s350_s10 = scalar_lea.sflag [#allocation4], %s978_s23  ;;  %s685_s30 = scalar_lea.vmem %s1016_s5, 64 }
  0x5f   : > { %p686_p8 = scmp.ne.s32.totalorder %s1016_s5, %s685_s30  ;;  %p1110_p0 = scmp.ne.s32.totalorder %s1102_s25, 0 }
  0x60   : > { %v272_v8 = vrot.slane %v271_v6, 2  ;;  %v278_v9 = vmax.f32 %v276_v5, %v277_v7  ;;  %v320_v41 = vrot.slane %v314_v40, %v319_v38  ;;  %v324_v42 = vrot.slane %v314_v40, %v323_v39  ;;  %s808_s9 = smov [#allocation7]  }
  0x61   : > { %p687_p7 = pnand %p686_p8, %p1110_p0  ;;  %s689_s7 = sshll.u32 %s808_s9, 4  ;;  %s690_s7 = int_to_ptr.vmem [resolvable:$false] %s689_s7 }
  0x62   : > { %v273_v10 = vmax.f32 %v271_v6, %v272_v8  ;;  %v279_v11 = vrot.slane %v278_v9, 2  ;;  %vm325_vm1 = vcmp.eq.s32.totalorder %v316_v36, %v320_v41  ;;  %vm326_vm2 = vcmp.eq.s32.totalorder %v316_v36, %v324_v42  ;;  %s691_s22 = scalar_lea.vmem %s690_s7, 128  ;;  %p692_p10 = scmp.lt.s32.totalorder %s1016_s5, %s690_s7 }
  0x63   : > { %v535_v46 = vsel %vm325_vm1, 1.0, %v807_v0  ;;  %v536_v47 = vsel %vm326_vm2, 1.0, %v807_v0  ;;  %v342_v54 = vld [vmem:[%s995_s6] sm:$0xf]  ;;  %v345_v55 = vld [vmem:[%s998_s4] sm:$0xf]  ;;  %p688_p4 = pneg %p687_p7  ;;  %p693_p12 = scmp.lt.s32.totalorder %s691_s22, %s685_s30 }
  0x64   : > { %v274_v12 = vrot.slane %v273_v10, 1  ;;  %v280_v13 = vmax.f32 %v278_v9, %v279_v11  ;;  %v341_v51 = vadd.f32 %v536_v47, %v535_v46 }
  0x65   : > { %p694_p1 = por %p693_p12, %p692_p10 }
  0x66   : > { %v275_v14 = vmax.f32 %v273_v10, %v274_v12  ;;  %v281_v15 = vrot.slane %v280_v13, 1 }
  0x67   : > { %p695_p2 = pnand %p694_p1, %p688_p4 }
  0x68   : > { %v282_v16 = vmax.f32 %v280_v13, %v281_v15 }
  0x6a   : > { %v285_v17 = vcombine.low %v275_v14, %v282_v16 }
  0x6c   : > { %v287_v18 = vsub.f32 %v264_v1, %v285_v17 }
  0x6e   : > { %v288_v19 = vmul.f32 1.442695, %v287_v18 }
  0x70   : > { %619 = vpow2.f32 %v288_v19 }
  0x7a   : > { %v620_v20 = vpop.eup %619 }
  0x7b   : > { %v291_v21 = vcombine.high %v620_v20, %v620_v20  ;;  %v293_v22 = vsel %vm268_vm0, %v620_v20, 0.0 }
  0x7c   : > { %v294_v23 = vrot.slane %v293_v22, 4 }
  0x7d   : > { %v300_v24 = vsel %vm268_vm0, %v291_v21, 0.0 }
  0x7e   : > { %v295_v25 = vadd.f32 %v294_v23, %v293_v22  ;;  %v301_v26 = vrot.slane %v300_v24, 4 }
  0x80   : > { %v296_v27 = vrot.slane %v295_v25, 2  ;;  %v302_v28 = vadd.f32 %v301_v26, %v300_v24 }
  0x82   : > { %v297_v29 = vadd.f32 %v296_v27, %v295_v25  ;;  %v303_v30 = vrot.slane %v302_v28, 2 }
  0x84   : > { %v298_v32 = vrot.slane %v297_v29, 1  ;;  %v304_v33 = vadd.f32 %v303_v30, %v302_v28 }
  0x86   : > { %v299_v34 = vadd.f32 %v298_v32, %v297_v29  ;;  %v305_v35 = vrot.slane %v304_v33, 1 }
  0x88   : > { %v306_v37 = vadd.f32 %v305_v35, %v304_v33  ;;  %621 = vrcp.f32 %v299_v34 }
  0x8a   : > { %623 = vrcp.f32 %v306_v37 }
  0x92   : > { %v622_v43 = vpop.eup %621 }
  0x94   : > { %v624_v44 = vpop.eup %623 }
  0x95   : > { %v311_v45 = vcombine.low %v622_v43, %v624_v44 }
  0x97   : > { %v313_v48 = vmul.f32 %v620_v20, %v311_v45 }
  0x99   : > { %v331_v49 = vmul.f32 %v535_v46, %v313_v48  ;;  %v336_v50 = vrot.slane %v313_v48, 4 }
  0x9b   : > { %v338_v52 = vmul.f32 %v536_v47, %v336_v50  ;;  %v340_v53 = vadd.f32 %v336_v50, %v313_v48 }
  0x9d   : > { %v339_v56 = vadd.f32 %v338_v52, %v331_v49  ;;  %v346_v57 = vadd.f32 %v341_v51, %v340_v53 }
  0x9f   : > { %v343_v58 = vadd.f32 %v342_v54, %v339_v56  ;;  %v347_v59 = vadd.f32 %v346_v57, %v345_v55 }
  0xa1   : > { %344 = vst [vmem:[%s995_s6] sm:$0xf] %v343_v58  ;;  %348 = vst [vmem:[%s998_s4] sm:$0xf] %v347_v59 }
  0xa2   : > { %698 = shalt.err (!%p695_p2)
}
  0xa3   : > { %s699_s29 = scalar_lea.hbm %s1014_s19, 64  ;;  %s703_s24 = scalar_lea.hbm %s1096_s2, 128 }
  0xa4   : > { %p700_p9 = scmp.ne.s32.totalorder %s1014_s19, %s699_s29  ;;  %p704_p6 = scmp.lt.u32.totalorder %s1014_s19, %s1096_s2 }
  0xa5   : > { %p705_p13 = scmp.lt.u32.totalorder %s703_s24, %s699_s29  ;;  %p707_p8 = scmp.lt.u32.totalorder %s699_s29, %s1014_s19 }
  0xa6   : > { %p701_p11 = pnand %p700_p9, %p1110_p0 }
  0xa7   : > { %p706_p5 = por %p705_p13, %p704_p6 }
  0xa8   : > { %p702_p3 = pneg %p701_p11 }
  0xa9   : > { %p708_p7 = por %p707_p8, %p706_p5 }
  0xab   : > { %p709_p4 = pnand %p708_p7, %p702_p3 }
  0xad   : > { %712 = shalt.err (!%p709_p4)
}
  0xae   : > { %549 = dma.vmem_to_hbm [thread:$0]  (%p1110_p0), %s1016_s5, 64, %s1014_s19, %s350_s10  }
  0xaf   : > { %s355_s21 = scalar_lea.sflag [#allocation9], %s978_s23  ;;  %s713_s8 = scalar_lea.vmem %s1023_s18, 64 }
  0xb0   : > { %p714_p10 = scmp.ne.s32.totalorder %s1023_s18, %s713_s8  ;;  %s809_s30 = smov [#allocation8]  }
  0xb1   : > { %s717_s9 = sshll.u32 %s809_s30, 4  ;;  %s718_s9 = int_to_ptr.vmem [resolvable:$false] %s717_s9 }
  0xb2   : > { %p715_p12 = pnand %p714_p10, %p1110_p0  ;;  %s719_s7 = scalar_lea.vmem %s718_s9, 128 }
  0xb3   : > { %p720_p2 = scmp.lt.s32.totalorder %s1023_s18, %s718_s9  ;;  %p721_p9 = scmp.lt.s32.totalorder %s719_s7, %s713_s8 }
  0xb4   : > { %p716_p1 = pneg %p715_p12 }
  0xb5   : > { %p722_p11 = por %p721_p9, %p720_p2 }
  0xb7   : > { %p723_p3 = pnand %p722_p11, %p716_p1 }
  0xb9   : > { %726 = shalt.err (!%p723_p3)
}
  0xba   : > { %s727_s23 = scalar_lea.hbm %s1021_s15, 64  ;;  %s731_s10 = scalar_lea.hbm %s1097_s3, 128 }
  0xbb   : > { %p728_p6 = scmp.ne.s32.totalorder %s1021_s15, %s727_s23  ;;  %p732_p8 = scmp.lt.u32.totalorder %s1021_s15, %s1097_s3 }
  0xbc   : > { %p733_p7 = scmp.lt.u32.totalorder %s731_s10, %s727_s23  ;;  %p735_p10 = scmp.lt.u32.totalorder %s727_s23, %s1021_s15 }
  0xbd   : > { %p729_p13 = pnand %p728_p6, %p1110_p0 }
  0xbe   : > { %p734_p4 = por %p733_p7, %p732_p8 }
  0xbf   : > { %p730_p5 = pneg %p729_p13 }
  0xc0   : > { %p736_p12 = por %p735_p10, %p734_p4 }
  0xc2   : > { %p737_p1 = pnand %p736_p12, %p730_p5 }
  0xc4   : > { %740 = shalt.err (!%p737_p1)
}
  0xc5   : > { %550 = dma.vmem_to_hbm [thread:$0]  (%p1110_p0), %s1023_s18, 64, %s1021_s15, %s355_s21  }
  0xc6 PF: > { %s393_s6 = sand.u32 1, %s783_s12   ;;  %p1111_p2 = scmp.ne.s32.totalorder %s1103_s27, 0 }
  0xc7   : > { %p1112_p9 = scmp.ge.s32.totalorder %s803_s17, 2  ;;  %s394_s4 = scalar_lea.sflag [#allocation4], %s393_s6 }
  0xc9   : > { %p561_p11 = pnand %p1112_p9, %p1111_p2 }
  0xcb   : > { %774 = dma.done.wait (!%p561_p11), %s394_s4, 64  }
  0xcc   : > { %776 = vsyncadd (!%p561_p11), %s394_s4, 4294967232  ;;  %s403_s24 = scalar_lea.sflag [#allocation9], %s393_s6 }
  0xcd   : > { %778 = dma.done.wait (!%p561_p11), %s403_s24, 64  }
  0xce   : > { %780 = vsyncadd (!%p561_p11), %s403_s24, 4294967232  ;;  %s26_s17 = sadd.s32 1, %s803_s17   ;;  %s1113_s12 = smov %s787_s13 }
  0xcf   : > { %p23_p3 = scmp.ge.s32.totalorder %s26_s17, 4   ;;  %s1114_s13 = smov %s791_s14 }
  0xd0   : > { %s1115_s14 = smov %s886_s26  ;;  %s1116_s15 = smov %s799_s16 }
  0xd1   : > { %s1117_s16 = smov %s1119_s20  ;;  %25 = sbr.rel (!%p23_p3) target bundleno = 10 (0xa), region = 107 }
  0xd8   :  { %408 = vsyncpa [#allocation3], 1 }
  0xd9   :  { %410 = vsyncpa [#allocation3 + $0x1], 1 }
  0xda   :  { %411 = vsyncpa [#allocation6], 1 }
  0xdb   :  { %413 = vsyncpa [#allocation6 + $0x1], 1 }
  0xdc   :  { %414 = vsyncpa [#allocation4], 1 }
  0xdd   :  { %416 = vsyncpa [#allocation4 + $0x1], 1 }
  0xde   :  { %417 = vsyncpa [#allocation9], 1 }
  0xdf   :  { %419 = vsyncpa [#allocation9 + $0x1], 1 }

</bundles_post_ra>
